<compile_context>
chip_gen: v5e
topology: v5e:2x2
jax: 0.10.0
libtpu: 0.0.40
codegen_flags: <defaults>
</compile_context>

<pallas_src>
import jax
import jax.numpy as jnp
from jax.experimental import pallas as pl
from jax.experimental.pallas import tpu as pltpu


def add_relu_conv1x1_kernel(a_ref, b_ref, w_ref, o_ref):
    # a_ref, b_ref: (C_in, HW) f32 ; w_ref: (co_tile, C_in) bf16 ; o_ref: (co_tile, HW) f32
    # elementwise add -> ReLU kept in f32 (VPU; v5e has no bf16 VALU path)
    x = jnp.maximum(a_ref[...] + b_ref[...], 0.0)
    # 1x1 conv as matmul on the MXU: bf16 operands, f32 accumulation
    o_ref[...] = jnp.dot(
        w_ref[...],
        x.astype(jnp.bfloat16),
        preferred_element_type=jnp.float32,
    ).astype(o_ref.dtype)


def add_relu_conv1x1(x297, x311, weight, *, co_tile=None):
    """
    x297, x311: (N, C_in, H, W)   float32 (NCHW, PyTorch convention)
    weight:     (C_out, C_in, 1, 1) float32 (PyTorch Conv2d weight, bias=False)
    returns:    (N, C_out, H, W)  float32
    """
    N, C_in, H, W = x297.shape
    C_out = weight.shape[0]
    HW = H * W

    # Split C_out into 2 tiles when cleanly possible (sublane dim must stay a
    # multiple of 8). For C_out=336 -> co_tile=168, n_co=2.
    if co_tile is None:
        if C_out % 2 == 0 and (C_out // 2) % 8 == 0:
            co_tile = C_out // 2
        else:
            co_tile = C_out
    assert C_out % co_tile == 0 and (co_tile % 8 == 0 or co_tile == C_out)
    n_co = C_out // co_tile

    # All reshapes below are contiguous views -> zero data movement in HBM.
    a = x297.reshape(N, C_in, HW)
    b = x311.reshape(N, C_in, HW)
    # 1x1 kernel -> plain (C_out, C_in) matrix, stored bf16 (halves weight HBM bytes)
    w = weight.reshape(C_out, C_in).astype(jnp.bfloat16)

    cost = pl.CostEstimate(
        flops=2 * N * C_out * C_in * HW,
        bytes_accessed=(
            4 * (2 * N * C_in * HW)    # a, b (f32)
            + 2 * C_out * C_in         # weight (bf16)
            + 4 * N * C_out * HW       # output (f32)
        ),
        transcendentals=0,
    )

    out_flat = pl.pallas_call(
        add_relu_conv1x1_kernel,
        out_shape=jax.ShapeDtypeStruct((N, C_out, HW), x297.dtype),
        grid=(N, n_co),
        in_specs=[
            # batch dim squeezed (None) -> kernel sees (C_in, HW) tiles;
            # index maps constant along the C_out axis -> a/b stay resident.
            pl.BlockSpec((None, C_in, HW), lambda n, co: (n, 0, 0)),
            pl.BlockSpec((None, C_in, HW), lambda n, co: (n, 0, 0)),
            # per-tile weight slab (co_tile, C_in)
            pl.BlockSpec((co_tile, C_in), lambda n, co: (co, 0)),
        ],
        out_specs=pl.BlockSpec((None, co_tile, HW), lambda n, co: (n, co, 0)),
        compiler_params=pltpu.CompilerParams(
            # batch and C_out tiles are fully independent -> megacore split on v7x
            dimension_semantics=("parallel", "parallel"),
        ),
        cost_estimate=cost,
    )(a, b, w)

    return out_flat.reshape(N, C_out, H, W)


if __name__ == "__main__":
    key = jax.random.PRNGKey(0)
    k1, k2, k3 = jax.random.split(key, 3)

    # Shapes from the original module: Conv2d(336, 336, 1x1), 1x336x14x14 inputs.
    N, C, H, W = 1, 336, 14, 14
    x297 = jax.random.normal(k1, (N, C, H, W), dtype=jnp.float32)
    x311 = jax.random.normal(k2, (N, C, H, W), dtype=jnp.float32)
    weight = jax.random.normal(k3, (C, C, 1, 1), dtype=jnp.float32) * 0.05

    out = add_relu_conv1x1(x297, x311, weight)
    out = jax.block_until_ready(out)

    # Reference: add -> relu -> 1x1 conv with the same bf16-operand / f32-acc
    # numerics as the kernel (operands rounded to bf16, accumulation in f32).
    ref_x = jnp.maximum(x297 + x311, 0.0)
    ref = jnp.einsum(
        "oc,nchw->nohw",
        weight[:, :, 0, 0].astype(jnp.bfloat16),
        ref_x.astype(jnp.bfloat16),
        preferred_element_type=jnp.float32,
    )
    assert out.shape == (N, C, H, W)
    assert jnp.allclose(out, ref, atol=1e-2, rtol=1e-2)

    print("KERNEL_OK")
</pallas_src>

<mosaic_0001>
module attributes {stable_mosaic.version = 11 : i64} {
  func.func @add_relu_conv1x1_kernel(%arg0: i32, %arg1: i32, %arg2: memref<1x336x196xf32, #tpu.memory_space<vmem>>, %arg3: memref<1x336x196xf32, #tpu.memory_space<vmem>>, %arg4: memref<168x336xbf16, #tpu.memory_space<vmem>>, %arg5: memref<1x168x196xf32, #tpu.memory_space<vmem>>) attributes {dimension_semantics = [#tpu.dimension_semantics<parallel>, #tpu.dimension_semantics<parallel>], iteration_bounds = array<i64: 1, 2>, scalar_prefetch = 0 : i64, scratch_operands = 0 : i64, tpu.core_type = #tpu.core_type<tc>, window_params = [{transform_indices = @transform_0, window_bounds = array<i64: 1, 336, 196>}, {transform_indices = @transform_1, window_bounds = array<i64: 1, 336, 196>}, {transform_indices = @transform_2, window_bounds = array<i64: 168, 336>}, {transform_indices = @transform_3, window_bounds = array<i64: 1, 168, 196>}]} {
    %c0 = arith.constant 0 : index
    %c0_0 = arith.constant 0 : index
    %c0_1 = arith.constant 0 : index
    %0 = vector.load %arg2[%c0, %c0_0, %c0_1] : memref<1x336x196xf32, #tpu.memory_space<vmem>>, vector<1x336x196xf32>
    %1 = vector.shape_cast %0 : vector<1x336x196xf32> to vector<336x196xf32>
    %c0_2 = arith.constant 0 : index
    %c0_3 = arith.constant 0 : index
    %c0_4 = arith.constant 0 : index
    %2 = vector.load %arg3[%c0_2, %c0_3, %c0_4] : memref<1x336x196xf32, #tpu.memory_space<vmem>>, vector<1x336x196xf32>
    %3 = vector.shape_cast %2 : vector<1x336x196xf32> to vector<336x196xf32>
    %4 = arith.addf %1, %3 : vector<336x196xf32>
    %cst = arith.constant 0.000000e+00 : f32
    %5 = vector.broadcast %cst : f32 to vector<336x196xf32>
    %6 = arith.maximumf %4, %5 : vector<336x196xf32>
    %c0_5 = arith.constant 0 : index
    %c0_6 = arith.constant 0 : index
    %7 = vector.load %arg4[%c0_5, %c0_6] : memref<168x336xbf16, #tpu.memory_space<vmem>>, vector<168x336xbf16>
    %8 = arith.truncf %6 : vector<336x196xf32> to vector<336x196xbf16>
    %cst_7 = arith.constant dense<0.000000e+00> : vector<168x196xf32>
    %9 = tpu.matmul %7, %8, %cst_7 {dimension_numbers = #tpu.dot_dimension_numbers<[1], [0], [0], [1], [0, 0, 1, 1], [], []>} : vector<168x336xbf16>, vector<336x196xbf16>, vector<168x196xf32> -> vector<168x196xf32>
    %c0_8 = arith.constant 0 : index
    %c0_9 = arith.constant 0 : index
    %c0_10 = arith.constant 0 : index
    %10 = vector.load %arg5[%c0_8, %c0_9, %c0_10] : memref<1x168x196xf32, #tpu.memory_space<vmem>>, vector<1x168x196xf32>
    %11 = vector.shape_cast %10 : vector<1x168x196xf32> to vector<168x196xf32>
    %12 = vector.shape_cast %9 : vector<168x196xf32> to vector<1x168x196xf32>
    tpu.vector_store %arg5[%c0_8, %c0_9, %c0_10], %12 {strides = array<i32>} : memref<1x168x196xf32, #tpu.memory_space<vmem>>, vector<1x168x196xf32>,
    return
  }
  func.func @transform_0(%arg0: i32, %arg1: i32) -> (i32, i32, i32) {
    %c0_i32 = arith.constant 0 : i32
    %c0_i32_0 = arith.constant 0 : i32
    %c0_i32_1 = arith.constant 0 : i32
    return %arg0, %c0_i32, %c0_i32_0 : i32, i32, i32
  }
  func.func @transform_1(%arg0: i32, %arg1: i32) -> (i32, i32, i32) {
    %c0_i32 = arith.constant 0 : i32
    %c0_i32_0 = arith.constant 0 : i32
    %c0_i32_1 = arith.constant 0 : i32
    return %arg0, %c0_i32, %c0_i32_0 : i32, i32, i32
  }
  func.func @transform_2(%arg0: i32, %arg1: i32) -> (i32, i32) {
    %c0_i32 = arith.constant 0 : i32
    %c0_i32_0 = arith.constant 0 : i32
    return %arg1, %c0_i32 : i32, i32
  }
  func.func @transform_3(%arg0: i32, %arg1: i32) -> (i32, i32, i32) {
    %c0_i32 = arith.constant 0 : i32
    %c0_i32_0 = arith.constant 0 : i32
    return %arg0, %arg1, %c0_i32 : i32, i32, i32
  }
}

</mosaic_0001>

<bundles_post_ra>
// kernel: tpu_custom_call.1
= control target key start
LH: loop header
LB: loop body
LE: loop exit
PB: predicated region body
PF: predicated region fallthrough
CT: control target
= control target key end

     0   :  { %s1661_s12 = smov 0   ;;  %s1663_s13 = smov 0   ;;  %s2576_s0 = inlined_call_operand.vmem [shape: f32[1,336,196], index: 0, kind: input, shape index: {}]   ;;  %s2577_s1 = inlined_call_operand.vmem [shape: f32[1,336,196], index: 1, kind: input, shape index: {}]   ;;  %s2578_s2 = inlined_call_operand.vmem [shape: bf16[336,336], index: 2, kind: input, shape index: {}]   ;;  %s2579_s3 = inlined_call_operand.vmem [shape: f32[1,336,196], index: 3, kind: output, shape index: {}]  }
   0x1   :  { %s1665_s14 = smov 0  }
   0x2 LB: > { %s22_s15 = sadd.s32 1, %s1635_s13  ;;  %p1400_p0 = scmp.ge.s32.totalorder %s1639_s14, 1  ;;  %s1639_s14 = sphi %s1665_s14, %s13_s14   ;;  %s1635_s13 = sphi %s1663_s13, %s2582_s13   ;;  %s1631_s12 = sphi %s1661_s12, %s2581_s12  }
   0x3   : > { %p23_p1 = scmp.ge.s32.totalorder %s22_s15, 2  ;;  %p173_p2 = scmp.lt.s32.totalorder %s1639_s14, 3 }
   0x5   : > { %s2584_s15 = smov (%p23_p1, %s22_s15), 0  ;;  %p174_p3 = pnand %p1400_p0, %p173_p2 }
   0x6   : > { %s223_s22 = smul.u32 (!%p174_p3), 21, %s1631_s12 }
   0x7   : > { %177 = sbr.rel (%p174_p3) target bundleno = 442 (0x1ba), region = 32 }
   0x8   : > { %p1720_p4 = scmp.lt.s32.totalorder (!%p174_p3), %s223_s22, 41 }
   0xc   : > { %v270_v0 = vld [vmem:[%s2576_s0 + $0xe0] sm:$0xff]  ;;  %v272_v1 = vld [vmem:[%s2576_s0 + $0xf0] sm:$0xff]  ;;  %s2586_s22 = smov (!%p1720_p4, %s223_s22), 41  ;;  %vm822_vm0 = vcmask 654336   ;;  %vm1235_vm1 = vcmask 556032  }
   0xd   : > { %v354_v2 = vld [vmem:[%s2577_s1 + $0xe0] sm:$0xff]  ;;  %v356_v3 = vld [vmem:[%s2577_s1 + $0xf0] sm:$0xff]  ;;  %s1592_s24 = smul.u32 12, %s2586_s22  ;;  %s1548_s27 = sshll.u32 %s2586_s22, 4 }
   0xe   : > { %v438_v4 = vadd.f32 %v354_v2, %v270_v0  ;;  %v322_v5 = vld [vmem:[%s2576_s0 + $0x280] sm:$0xff]  ;;  %v324_v6 = vld [vmem:[%s2576_s0 + $0x290] sm:$0xff]  ;;  %v440_v7 = vadd.f32 %v356_v3, %v272_v1  ;;  %s2444_s18 = scalar_lea.vmem %s2579_s3, %s1548_s27 }
   0xf   : > { %v406_v8 = vld [vmem:[%s2577_s1 + $0x280] sm:$0xff]  ;;  %v408_v9 = vld [vmem:[%s2577_s1 + $0x290] sm:$0xff]  ;;  %s1827_s16 = scalar_lea.vmem %s2578_s2, %s1592_s24 }
  0x10   : > { %v266_v10 = vld [vmem:[%s2576_s0 + $0xc0] sm:$0xff]  ;;  %v522_v11 = vmax.f32 %v438_v4, 0.0  ;;  %v490_v12 = vadd.f32 %v406_v8, %v322_v5  ;;  %v492_v13 = vadd.f32 %v408_v9, %v324_v6  ;;  %v268_v14 = vld [vmem:[%s2576_s0 + $0xd0] sm:$0xff]  ;;  %v524_v17 = vmax.f32 %v440_v7, 0.0 }
  0x11   : > { %v350_v15 = vld [vmem:[%s2577_s1 + $0xc0] sm:$0xff]  ;;  %v352_v16 = vld [vmem:[%s2577_s1 + $0xd0] sm:$0xff] }
  0x12   : > { %v434_v18 = vadd.f32 %v350_v15, %v266_v10  ;;  %v436_v19 = vadd.f32 %v352_v16, %v268_v14  ;;  %v318_v20 = vld [vmem:[%s2576_s0 + $0x260] sm:$0xff]  ;;  %v320_v21 = vld [vmem:[%s2576_s0 + $0x270] sm:$0xff]  ;;  %v574_v23 = vmax.f32 %v490_v12, 0.0  ;;  %v576_v24 = vmax.f32 %v492_v13, 0.0 }
  0x13   : > { %v402_v22 = vld [vmem:[%s2577_s1 + $0x260] sm:$0xff]  ;;  %v404_v25 = vld [vmem:[%s2577_s1 + $0x270] sm:$0xff]  ;;  %v634_v29 = vpack.c.bf16 %v524_v17, %v522_v11 }
  0x14   : > { %v486_v26 = vadd.f32 %v402_v22, %v318_v20  ;;  %v262_v27 = vld [vmem:[%s2576_s0 + $0xa0] sm:$0xff]  ;;  %v264_v28 = vld [vmem:[%s2576_s0 + $0xb0] sm:$0xff]  ;;  %v518_v30 = vmax.f32 %v434_v18, 0.0  ;;  %v520_v31 = vmax.f32 %v436_v19, 0.0  ;;  %v488_v32 = vadd.f32 %v404_v25, %v320_v21 }
  0x15   : > { %v346_v33 = vld [vmem:[%s2577_s1 + $0xa0] sm:$0xff]  ;;  %v348_v34 = vld [vmem:[%s2577_s1 + $0xb0] sm:$0xff]  ;;  %v660_v36 = vpack.c.bf16 %v576_v24, %v574_v23  ;;  %856 = vmatpush.bf16.msra.mxu0 %v634_v29  ;;  %1579 = vmatpush.bf16.msra.mxu1 %v634_v29 }
  0x16   : > { %v314_v35 = vld [vmem:[%s2576_s0 + $0x240] sm:$0xff]  ;;  %v570_v37 = vmax.f32 %v486_v26, 0.0  ;;  %v430_v38 = vadd.f32 %v346_v33, %v262_v27  ;;  %v432_v39 = vadd.f32 %v348_v34, %v264_v28  ;;  %v316_v40 = vld [vmem:[%s2576_s0 + $0x250] sm:$0xff]  ;;  %v632_v43 = vpack.c.bf16 %v520_v31, %v518_v30  ;;  %v303_v31 = vld [vmem:[%s2576_s0 + $0x1e8] sm:$0xff] }
  0x17   : > { %v398_v41 = vld [vmem:[%s2577_s1 + $0x240] sm:$0xff]  ;;  %v400_v42 = vld [vmem:[%s2577_s1 + $0x250] sm:$0xff]  ;;  %v572_v44 = vmax.f32 %v488_v32, 0.0  ;;  %985 = vmatpush.bf16.msra.mxu2 %v660_v36  ;;  %1587 = vmatpush.bf16.msra.mxu3 %v660_v36  ;;  %v387_v36 = vld [vmem:[%s2577_s1 + $0x1e8] sm:$0xff] }
  0x18   : > { %v482_v45 = vadd.f32 %v398_v41, %v314_v35  ;;  %v484_v46 = vadd.f32 %v400_v42, %v316_v40  ;;  %v258_v47 = vld [vmem:[%s2576_s0 + $0x80] sm:$0xff]  ;;  %v260_v48 = vld [vmem:[%s2576_s0 + $0x90] sm:$0xff]  ;;  %v514_v50 = vmax.f32 %v430_v38, 0.0  ;;  %v516_v51 = vmax.f32 %v432_v39, 0.0  ;;  %v305_v35 = vld [vmem:[%s2576_s0 + $0x1f8] sm:$0xff] }
  0x19   : > { %v342_v49 = vld [vmem:[%s2577_s1 + $0x80] sm:$0xff]  ;;  %v344_v52 = vld [vmem:[%s2577_s1 + $0x90] sm:$0xff]  ;;  %v658_v56 = vpack.c.bf16 %v572_v44, %v570_v37  ;;  %857 = vmatpush.bf16.msra.mxu0 %v632_v43  ;;  %1580 = vmatpush.bf16.msra.mxu1 %v632_v43  ;;  %v389_v37 = vld [vmem:[%s2577_s1 + $0x1f8] sm:$0xff]  ;;  %v471_v39 = vadd.f32 %v387_v36, %v303_v31 }
  0x1a   : > { %v426_v53 = vadd.f32 %v342_v49, %v258_v47  ;;  %v310_v54 = vld [vmem:[%s2576_s0 + $0x220] sm:$0xff]  ;;  %v312_v55 = vld [vmem:[%s2576_s0 + $0x230] sm:$0xff]  ;;  %v566_v57 = vmax.f32 %v482_v45, 0.0  ;;  %v568_v58 = vmax.f32 %v484_v46, 0.0  ;;  %v428_v59 = vadd.f32 %v344_v52, %v260_v48  ;;  %v1414_v38 = vld [vmem:[%s1827_s16 + $0x8] sm:$0xf] }
  0x1b   : > { %v394_v60 = vld [vmem:[%s2577_s1 + $0x220] sm:$0xff]  ;;  %v396_v61 = vld [vmem:[%s2577_s1 + $0x230] sm:$0xff]  ;;  %v630_v63 = vpack.c.bf16 %v516_v51, %v514_v50  ;;  %986 = vmatpush.bf16.msra.mxu2 %v658_v56  ;;  %1588 = vmatpush.bf16.msra.mxu3 %v658_v56  ;;  %v473_v40 = vadd.f32 %v389_v37, %v305_v35  ;;  %v555_v48 = vmax.f32 %v471_v39, 0.0  ;;  %v407_v56 = vld [vmem:[%s2577_s1 + $0x288] sm:$0xff] }
  0x1c   : > { %v254_v62 = vld [vmem:[%s2576_s0 + $0x60] sm:$0xff]  ;;  %v478_v0 = vadd.f32 %v394_v60, %v310_v54  ;;  %v480_v1 = vadd.f32 %v396_v61, %v312_v55  ;;  %v256_v2 = vld [vmem:[%s2576_s0 + $0x70] sm:$0xff]  ;;  %v510_v5 = vmax.f32 %v426_v53, 0.0  ;;  %v512_v6 = vmax.f32 %v428_v59, 0.0  ;;  %v323_v54 = vld [vmem:[%s2576_s0 + $0x288] sm:$0xff] }
  0x1d   : > { %v338_v3 = vld [vmem:[%s2577_s1 + $0x60] sm:$0xff]  ;;  %v340_v4 = vld [vmem:[%s2577_s1 + $0x70] sm:$0xff]  ;;  %v656_v12 = vpack.c.bf16 %v568_v58, %v566_v57  ;;  %858 = vmatpush.bf16.msra.mxu0 %v630_v63  ;;  %1581 = vmatpush.bf16.msra.mxu1 %v630_v63  ;;  %v557_v49 = vmax.f32 %v473_v40, 0.0  ;;  %v325_v55 = vld [vmem:[%s2576_s0 + $0x298] sm:$0xff] }
  0x1e   : > { %v422_v7 = vadd.f32 %v338_v3, %v254_v62  ;;  %v424_v8 = vadd.f32 %v340_v4, %v256_v2  ;;  %v306_v9 = vld [vmem:[%s2576_s0 + $0x200] sm:$0xff]  ;;  %v308_v10 = vld [vmem:[%s2576_s0 + $0x210] sm:$0xff]  ;;  %v562_v13 = vmax.f32 %v478_v0, 0.0  ;;  %v564_v14 = vmax.f32 %v480_v1, 0.0  ;;  %v409_v58 = vld [vmem:[%s2577_s1 + $0x298] sm:$0xff] }
  0x1f   : > { %v390_v11 = vld [vmem:[%s2577_s1 + $0x200] sm:$0xff]  ;;  %v392_v15 = vld [vmem:[%s2577_s1 + $0x210] sm:$0xff]  ;;  %v628_v25 = vpack.c.bf16 %v512_v6, %v510_v5  ;;  %987 = vmatpush.bf16.msra.mxu2 %v656_v12  ;;  %1589 = vmatpush.bf16.msra.mxu3 %v656_v12  ;;  %v651_v57 = vpack.c.bf16 %v557_v49, %v555_v48  ;;  %v1486_v59 = vld [vmem:[%s1827_s16 + $0x98] sm:$0xf]  ;;  %v491_v4 = vadd.f32 %v407_v56, %v323_v54 }
  0x20   : > { %v474_v16 = vadd.f32 %v390_v11, %v306_v9  ;;  %v250_v17 = vld [vmem:[%s2576_s0 + $0x40] sm:$0xff]  ;;  %v476_v18 = vadd.f32 %v392_v15, %v308_v10  ;;  %v252_v19 = vld [vmem:[%s2576_s0 + $0x50] sm:$0xff]  ;;  %v506_v26 = vmax.f32 %v422_v7, 0.0  ;;  %v508_v27 = vmax.f32 %v424_v8, 0.0  ;;  %v299_v1 = vld [vmem:[%s2576_s0 + $0x1c8] sm:$0xff] }
  0x21   : > { %v334_v20 = vld [vmem:[%s2577_s1 + $0x40] sm:$0xff]  ;;  %v336_v21 = vld [vmem:[%s2577_s1 + $0x50] sm:$0xff]  ;;  %v654_v32 = vpack.c.bf16 %v564_v14, %v562_v13  ;;  %859 = vmatpush.bf16.msra.mxu0 %v628_v25  ;;  %1582 = vmatpush.bf16.msra.mxu1 %v628_v25  ;;  %v493_v5 = vadd.f32 %v409_v58, %v325_v55  ;;  %v301_v6 = vld [vmem:[%s2576_s0 + $0x1d8] sm:$0xff] }
  0x22   : > { %v418_v22 = vadd.f32 %v334_v20, %v250_v17  ;;  %v246_v23 = vld [vmem:[%s2576_s0 + $0x20] sm:$0xff]  ;;  %v248_v24 = vld [vmem:[%s2576_s0 + $0x30] sm:$0xff]  ;;  %v420_v28 = vadd.f32 %v336_v21, %v252_v19  ;;  %v558_v33 = vmax.f32 %v474_v16, 0.0  ;;  %v560_v34 = vmax.f32 %v476_v18, 0.0  ;;  %v383_v7 = vld [vmem:[%s2577_s1 + $0x1c8] sm:$0xff] }
  0x23   : > { %v330_v29 = vld [vmem:[%s2577_s1 + $0x20] sm:$0xff]  ;;  %v332_v30 = vld [vmem:[%s2577_s1 + $0x30] sm:$0xff]  ;;  %v626_v46 = vpack.c.bf16 %v508_v27, %v506_v26  ;;  %988 = vmatpush.bf16.msra.mxu2 %v654_v32  ;;  %1590 = vmatpush.bf16.msra.mxu3 %v654_v32  ;;  %v385_v8 = vld [vmem:[%s2577_s1 + $0x1d8] sm:$0xff]  ;;  %v467_v10 = vadd.f32 %v383_v7, %v299_v1 }
  0x24   : > { %v1551_v41 = vld [vmem:[%s1827_s16 + $0x10] sm:$0xf0]  ;;  %v502_v42 = vmax.f32 %v418_v22, 0.0  ;;  %v504_v43 = vmax.f32 %v420_v28, 0.0  ;;  %v414_v44 = vadd.f32 %v330_v29, %v246_v23  ;;  %v242_v45 = vld [vmem:[%s2576_s0] sm:$0xff]  ;;  %v416_v47 = vadd.f32 %v332_v30, %v248_v24  ;;  %v271_v12 = vld [vmem:[%s2576_s0 + $0xe8] sm:$0xff] }
  0x25   : > { %v244_v50 = vld [vmem:[%s2576_s0 + $0x10] sm:$0xff]  ;;  %v326_v51 = vld [vmem:[%s2577_s1] sm:$0xff]  ;;  %v652_v53 = vpack.c.bf16 %v560_v34, %v558_v33  ;;  %v1884_v61 = vor.u32 %v1551_v41, %v1414_v38  ;;  %860 = vmatpush.bf16.msra.mxu0 %v626_v46  ;;  %1583 = vmatpush.bf16.msra.mxu1 %v626_v46  ;;  %v469_v11 = vadd.f32 %v385_v8, %v301_v6  ;;  %v273_v13 = vld [vmem:[%s2576_s0 + $0xf8] sm:$0xff]  ;;  %v551_v18 = vmax.f32 %v467_v10, 0.0 }
  0x26   : > { %v328_v52 = vld [vmem:[%s2577_s1 + $0x10] sm:$0xff]  ;;  %v1569_v60 = vld [vmem:[%s1827_s16 + $0xa0] sm:$0xf0]  ;;  %v624_v62 = vpack.c.bf16 %v504_v43, %v502_v42  ;;  %v498_v63 = vmax.f32 %v414_v44, 0.0  ;;  %v410_v0 = vadd.f32 %v326_v51, %v242_v45  ;;  %v500_v2 = vmax.f32 %v416_v47, 0.0  ;;  %v355_v14 = vld [vmem:[%s2577_s1 + $0xe8] sm:$0xff] }
  0x27   : > { %v412_v3 = vadd.f32 %v328_v52, %v244_v50  ;;  %989 = vmatpush.bf16.msra.mxu2 %v652_v53  ;;  %1591 = vmatpush.bf16.msra.mxu3 %v652_v53  ;;  %v1898_v9 = vor.u32 %v1569_v60, %v1486_v59  ;;  %v357_v15 = vld [vmem:[%s2577_s1 + $0xf8] sm:$0xff]  ;;  %v439_v16 = vadd.f32 %v355_v14, %v271_v12  ;;  %v553_v19 = vmax.f32 %v469_v11, 0.0  ;;  %v302_v25 = vld [vmem:[%s2576_s0 + $0x1e0] sm:$0xff]  ;;  %v304_v26 = vld [vmem:[%s2576_s0 + $0x1f0] sm:$0xff] }
  0x28   : > { %v494_v17 = vmax.f32 %v410_v0, 0.0  ;;  %v441_v20 = vadd.f32 %v357_v15, %v273_v13  ;;  %v622_v21 = vpack.c.bf16 %v500_v2, %v498_v63  ;;  %v575_v23 = vmax.f32 %v491_v4, 0.0  ;;  %v386_v27 = vld [vmem:[%s2577_s1 + $0x1e0] sm:$0xff]  ;;  %v1550_v29 = vld [vmem:[%s1827_s16 + $0x8] sm:$0xf0]  ;;  %v388_v33 = vld [vmem:[%s2577_s1 + $0x1f0] sm:$0xff] }
  0x29   : > { %861 = vmatpush.bf16.msra.mxu0 %v624_v62  ;;  %v496_v22 = vmax.f32 %v412_v3, 0.0  ;;  %v523_v24 = vmax.f32 %v439_v16, 0.0  ;;  %1584 = vmatpush.bf16.msra.mxu1 %v624_v62  ;;  %v1406_v28 = vld [vmem:[%s1827_s16] sm:$0xf]  ;;  %v577_v30 = vmax.f32 %v493_v5, 0.0  ;;  %v649_v31 = vpack.c.bf16 %v553_v19, %v551_v18  ;;  %v295_v36 = vld [vmem:[%s2576_s0 + $0x1a8] sm:$0xff] }
  0x2a   : > { %1524 = vmatmul.msk.bf16.vlgmr.msra.gmra.mxu2 %vm822_vm0, %v1884_v61  ;;  %1530 = vmatmul.msk.bf16.vlgmr.msra.gmra.mxu3 %vm822_vm0, %v1898_v9  ;;  %v525_v32 = vmax.f32 %v441_v20, 0.0  ;;  %v470_v34 = vadd.f32 %v386_v27, %v302_v25  ;;  %v472_v35 = vadd.f32 %v388_v33, %v304_v26  ;;  %v297_v37 = vld [vmem:[%s2576_s0 + $0x1b8] sm:$0xff]  ;;  %v379_v38 = vld [vmem:[%s2577_s1 + $0x1a8] sm:$0xff]  ;;  %v1478_v39 = vld [vmem:[%s1827_s16 + $0x90] sm:$0xf] }
  0x2b   : > { %1108 = vmatpush.bf16.msrb.mxu2 %v651_v57  ;;  %v1568_v40 = vld [vmem:[%s1827_s16 + $0x98] sm:$0xf0]  ;;  %v463_v44 = vadd.f32 %v379_v38, %v295_v36  ;;  %v620_v45 = vpack.c.bf16 %v496_v22, %v494_v17  ;;  %v267_v48 = vld [vmem:[%s2576_s0 + $0xc8] sm:$0xff]  ;;  %v661_v51 = vpack.c.bf16 %v577_v30, %v575_v23  ;;  %v1962_v57 = vor.u32 %v1550_v29, %v1406_v28  ;;  %v298_v0 = vld [vmem:[%s2576_s0 + $0x1c0] sm:$0xff] }
  0x2c   : > { %v635_v41 = vpack.c.bf16 %v525_v32, %v523_v24  ;;  %v554_v42 = vmax.f32 %v470_v34, 0.0  ;;  %v381_v43 = vld [vmem:[%s2577_s1 + $0x1b8] sm:$0xff]  ;;  %v556_v46 = vmax.f32 %v472_v35, 0.0  ;;  %v351_v50 = vld [vmem:[%s2577_s1 + $0xc8] sm:$0xff]  ;;  %v1973_v1 = vor.u32 %v1568_v40, %v1478_v39  ;;  %v1426_v2 = vld [vmem:[%s1827_s16 + $0x20] sm:$0xf] }
  0x2d   : > { %862 = vmatpush.bf16.msra.mxu0 %v622_v21  ;;  %v465_v47 = vadd.f32 %v381_v43, %v297_v37  ;;  %v269_v49 = vld [vmem:[%s2576_s0 + $0xd8] sm:$0xff]  ;;  %1585 = vmatpush.bf16.msra.mxu1 %v622_v21  ;;  %v547_v52 = vmax.f32 %v463_v44, 0.0  ;;  %v435_v54 = vadd.f32 %v351_v50, %v267_v48  ;;  %v319_v55 = vld [vmem:[%s2576_s0 + $0x268] sm:$0xff]  ;;  %v300_v7 = vld [vmem:[%s2576_s0 + $0x1d0] sm:$0xff] }
  0x2e   : > { %1045 = vmatpush.bf16.msrb.mxu3 %v635_v41  ;;  %v353_v53 = vld [vmem:[%s2577_s1 + $0xd8] sm:$0xff]  ;;  %v650_v58 = vpack.c.bf16 %v556_v46, %v554_v42  ;;  %v403_v62 = vld [vmem:[%s2577_s1 + $0x268] sm:$0xff]  ;;  %v382_v8 = vld [vmem:[%s2577_s1 + $0x1c0] sm:$0xff] }
  0x2f   : > { %1109 = vmatpush.bf16.msrb.mxu2 %v649_v31  ;;  %v321_v56 = vld [vmem:[%s2576_s0 + $0x278] sm:$0xff]  ;;  %v549_v59 = vmax.f32 %v465_v47, 0.0  ;;  %v437_v60 = vadd.f32 %v353_v53, %v269_v49  ;;  %v1554_v3 = vld [vmem:[%s1827_s16 + $0x28] sm:$0xf0]  ;;  %v519_v4 = vmax.f32 %v435_v54, 0.0  ;;  %v487_v5 = vadd.f32 %v403_v62, %v319_v55  ;;  %v384_v10 = vld [vmem:[%s2577_s1 + $0x1d0] sm:$0xff] }
  0x30   : > { %v405_v63 = vld [vmem:[%s2577_s1 + $0x278] sm:$0xff]  ;;  %v1498_v11 = vld [vmem:[%s1827_s16 + $0xb0] sm:$0xf]  ;;  %v466_v14 = vadd.f32 %v382_v8, %v298_v0  ;;  %v468_v15 = vadd.f32 %v384_v10, %v300_v7  ;;  %v263_v16 = vld [vmem:[%s2576_s0 + $0xa8] sm:$0xff]  ;;  %v2014_v36 = vor.u32 %v1554_v3, %v1426_v2 }
  0x31   : > { %v489_v6 = vadd.f32 %v405_v63, %v321_v56  ;;  %863 = vmatpush.bf16.msra.mxu0 %v620_v45  ;;  %v647_v12 = vpack.c.bf16 %v549_v59, %v547_v52  ;;  %v521_v13 = vmax.f32 %v437_v60, 0.0  ;;  %v265_v17 = vld [vmem:[%s2576_s0 + $0xb8] sm:$0xff]  ;;  %v347_v18 = vld [vmem:[%s2577_s1 + $0xa8] sm:$0xff]  ;;  %1586 = vmatpush.bf16.msra.mxu1 %v620_v45  ;;  %v571_v19 = vmax.f32 %v487_v5, 0.0  ;;  %v294_v39 = vld [vmem:[%s2576_s0 + $0x1a0] sm:$0xff] }
  0x32   : > { %v349_v21 = vld [vmem:[%s2577_s1 + $0xb8] sm:$0xff]  ;;  %v431_v22 = vadd.f32 %v347_v18, %v263_v16  ;;  %v291_v23 = vld [vmem:[%s2576_s0 + $0x188] sm:$0xff]  ;;  %v550_v27 = vmax.f32 %v466_v14, 0.0  ;;  %v552_v28 = vmax.f32 %v468_v15, 0.0  ;;  %v296_v43 = vld [vmem:[%s2576_s0 + $0x1b0] sm:$0xff] }
  0x33   : > { %v573_v20 = vmax.f32 %v489_v6, 0.0  ;;  %v293_v24 = vld [vmem:[%s2576_s0 + $0x198] sm:$0xff]  ;;  %1110 = vmatpush.bf16.msrb.mxu2 %v647_v12  ;;  %v633_v26 = vpack.c.bf16 %v521_v13, %v519_v4  ;;  %v433_v29 = vadd.f32 %v349_v21, %v265_v17  ;;  %v375_v30 = vld [vmem:[%s2577_s1 + $0x188] sm:$0xff]  ;;  %v378_v44 = vld [vmem:[%s2577_s1 + $0x1a0] sm:$0xff] }
  0x34   : > { %v1572_v25 = vld [vmem:[%s1827_s16 + $0xb8] sm:$0xf0]  ;;  %864 = vmatmul.bf16.vlgmr.msra.gmra.mxu0 %v1962_v57  ;;  %v515_v33 = vmax.f32 %v431_v22, 0.0  ;;  %v459_v34 = vadd.f32 %v375_v30, %v291_v23  ;;  %894 = vmatmul.bf16.vlgmr.msra.gmra.mxu1 %v1973_v1  ;;  %v648_v37 = vpack.c.bf16 %v552_v28, %v550_v27  ;;  %v380_v46 = vld [vmem:[%s2577_s1 + $0x1b0] sm:$0xff]  ;;  %v462_v47 = vadd.f32 %v378_v44, %v294_v39  ;;  %v399_v53 = vld [vmem:[%s2577_s1 + $0x248] sm:$0xff] }
  0x35   : > { %1174 = vmatpush.bf16.msrb.mxu0 %v661_v51  ;;  %919 = vmatpush.bf16.msrb.mxu1 %v650_v58  ;;  %v377_v31 = vld [vmem:[%s2577_s1 + $0x198] sm:$0xff]  ;;  %v659_v32 = vpack.c.bf16 %v573_v20, %v571_v19  ;;  %v517_v38 = vmax.f32 %v433_v29, 0.0  ;;  %v2019_v40 = vor.u32 %v1572_v25, %v1498_v11  ;;  %v464_v49 = vadd.f32 %v380_v46, %v296_v43  ;;  %v315_v51 = vld [vmem:[%s2576_s0 + $0x248] sm:$0xff]  ;;  %v1553_v62 = vld [vmem:[%s1827_s16 + $0x20] sm:$0xf0] }
  0x36   : > { %v461_v35 = vadd.f32 %v377_v31, %v293_v24  ;;  %1046 = vmatpush.bf16.msrb.mxu3 %v633_v26  ;;  %v543_v41 = vmax.f32 %v459_v34, 0.0  ;;  %v546_v50 = vmax.f32 %v462_v47, 0.0  ;;  %v317_v52 = vld [vmem:[%s2576_s0 + $0x258] sm:$0xff]  ;;  %v483_v56 = vadd.f32 %v399_v53, %v315_v51  ;;  %v259_v58 = vld [vmem:[%s2576_s0 + $0x88] sm:$0xff]  ;;  %v290_v16 = vld [vmem:[%s2576_s0 + $0x180] sm:$0xff] }
  0x37   : > { %v631_v45 = vpack.c.bf16 %v517_v38, %v515_v33  ;;  %v548_v54 = vmax.f32 %v464_v49, 0.0  ;;  %v401_v55 = vld [vmem:[%s2577_s1 + $0x258] sm:$0xff]  ;;  %v343_v0 = vld [vmem:[%s2577_s1 + $0x88] sm:$0xff]  ;;  %v292_v17 = vld [vmem:[%s2576_s0 + $0x190] sm:$0xff] }
  0x38   : > { %v545_v42 = vmax.f32 %v461_v35, 0.0  ;;  %v261_v59 = vld [vmem:[%s2576_s0 + $0x98] sm:$0xff]  ;;  %v485_v63 = vadd.f32 %v401_v55, %v317_v52  ;;  %v287_v3 = vld [vmem:[%s2576_s0 + $0x168] sm:$0xff]  ;;  %v567_v6 = vmax.f32 %v483_v56, 0.0  ;;  %v427_v7 = vadd.f32 %v343_v0, %v259_v58  ;;  %v374_v18 = vld [vmem:[%s2577_s1 + $0x180] sm:$0xff] }
  0x39   : > { %1175 = vmatpush.bf16.msrb.mxu0 %v659_v32  ;;  %920 = vmatpush.bf16.msrb.mxu1 %v648_v37  ;;  %v1418_v60 = vld [vmem:[%s1827_s16 + $0x18] sm:$0xf]  ;;  %v1490_v4 = vld [vmem:[%s1827_s16 + $0xa8] sm:$0xf]  ;;  %v646_v5 = vpack.c.bf16 %v548_v54, %v546_v50  ;;  %v1571_v19 = vld [vmem:[%s1827_s16 + $0xb0] sm:$0xf0]  ;;  %v458_v23 = vadd.f32 %v374_v18, %v290_v16 }
  0x3a   : > { %v645_v48 = vpack.c.bf16 %v545_v42, %v543_v41  ;;  %1525 = vmatmul.msk.bf16.gmra.mxu2 %vm822_vm0, %v2014_v36  ;;  %1047 = vmatpush.bf16.msrb.mxu3 %v631_v45  ;;  %v345_v2 = vld [vmem:[%s2577_s1 + $0x98] sm:$0xff]  ;;  %v371_v11 = vld [vmem:[%s2577_s1 + $0x168] sm:$0xff]  ;;  %v569_v13 = vmax.f32 %v485_v63, 0.0  ;;  %v511_v20 = vmax.f32 %v427_v7, 0.0  ;;  %v376_v22 = vld [vmem:[%s2577_s1 + $0x190] sm:$0xff]  ;;  %v2086_v28 = vor.u32 %v1553_v62, %v1418_v60 }
  0x3b   : > { %1531 = vmatmul.msk.bf16.gmra.mxu3 %vm822_vm0, %v2019_v40  ;;  %v429_v8 = vadd.f32 %v345_v2, %v261_v59  ;;  %v289_v10 = vld [vmem:[%s2576_s0 + $0x178] sm:$0xff]  ;;  %v455_v14 = vadd.f32 %v371_v11, %v287_v3  ;;  %v460_v27 = vadd.f32 %v376_v22, %v292_v17  ;;  %v542_v30 = vmax.f32 %v458_v23, 0.0  ;;  %v1557_v35 = vld [vmem:[%s1827_s16 + $0x40] sm:$0xf0]  ;;  %v1510_v37 = vld [vmem:[%s1827_s16 + $0xc8] sm:$0xf] }
  0x3c   : > { %1111 = vmatpush.bf16.msrb.mxu2 %v645_v48  ;;  %v373_v12 = vld [vmem:[%s2577_s1 + $0x178] sm:$0xff]  ;;  %v657_v24 = vpack.c.bf16 %v569_v13, %v567_v6  ;;  %v2088_v31 = vor.u32 %v1571_v19, %v1490_v4  ;;  %v1575_v38 = vld [vmem:[%s1827_s16 + $0xd0] sm:$0xf0]  ;;  %v255_v42 = vld [vmem:[%s2576_s0 + $0x68] sm:$0xff] }
  0x3d   : > { %v457_v15 = vadd.f32 %v373_v12, %v289_v10  ;;  %921 = vmatpush.bf16.msrb.mxu1 %v646_v5  ;;  %v513_v21 = vmax.f32 %v429_v8, 0.0  ;;  %v539_v25 = vmax.f32 %v455_v14, 0.0  ;;  %v544_v33 = vmax.f32 %v460_v27, 0.0  ;;  %v1438_v34 = vld [vmem:[%s1827_s16 + $0x38] sm:$0xf]  ;;  %v339_v44 = vld [vmem:[%s2577_s1 + $0x68] sm:$0xff] }
  0x3e   : > { %1176 = vmatpush.bf16.msrb.mxu0 %v657_v24  ;;  %v2096_v41 = vor.u32 %v1557_v35, %v1438_v34  ;;  %v257_v43 = vld [vmem:[%s2576_s0 + $0x78] sm:$0xff]  ;;  %v2107_v45 = vor.u32 %v1575_v38, %v1510_v37  ;;  %v423_v47 = vadd.f32 %v339_v44, %v255_v42  ;;  %v283_v51 = vld [vmem:[%s2576_s0 + $0x148] sm:$0xff]  ;;  %v286_v56 = vld [vmem:[%s2576_s0 + $0x160] sm:$0xff] }
  0x3f   : > { %v541_v26 = vmax.f32 %v457_v15, 0.0  ;;  %v629_v29 = vpack.c.bf16 %v513_v21, %v511_v20  ;;  %v644_v39 = vpack.c.bf16 %v544_v33, %v542_v30  ;;  %v341_v46 = vld [vmem:[%s2577_s1 + $0x78] sm:$0xff]  ;;  %v367_v53 = vld [vmem:[%s2577_s1 + $0x148] sm:$0xff]  ;;  %v288_v58 = vld [vmem:[%s2576_s0 + $0x170] sm:$0xff] }
  0x40   : > { %v425_v48 = vadd.f32 %v341_v46, %v257_v43  ;;  %v507_v49 = vmax.f32 %v423_v47, 0.0  ;;  %v285_v52 = vld [vmem:[%s2576_s0 + $0x158] sm:$0xff]  ;;  %v451_v55 = vadd.f32 %v367_v53, %v283_v51  ;;  %v1430_v59 = vld [vmem:[%s1827_s16 + $0x30] sm:$0xf]  ;;  %v370_v0 = vld [vmem:[%s2577_s1 + $0x160] sm:$0xff] }
  0x41   : > { %v643_v32 = vpack.c.bf16 %v541_v26, %v539_v25  ;;  %1048 = vmatpush.bf16.msrb.mxu3 %v629_v29  ;;  %922 = vmatpush.bf16.msrb.mxu1 %v644_v39  ;;  %v369_v54 = vld [vmem:[%s2577_s1 + $0x158] sm:$0xff]  ;;  %v372_v2 = vld [vmem:[%s2577_s1 + $0x170] sm:$0xff]  ;;  %v311_v3 = vld [vmem:[%s2576_s0 + $0x228] sm:$0xff]  ;;  %v454_v6 = vadd.f32 %v370_v0, %v286_v56 }
  0x42   : > { %v509_v50 = vmax.f32 %v425_v48, 0.0  ;;  %v1556_v60 = vld [vmem:[%s1827_s16 + $0x38] sm:$0xf0]  ;;  %v453_v63 = vadd.f32 %v369_v54, %v285_v52  ;;  %v1502_v4 = vld [vmem:[%s1827_s16 + $0xc0] sm:$0xf]  ;;  %v535_v5 = vmax.f32 %v451_v55, 0.0  ;;  %v456_v7 = vadd.f32 %v372_v2, %v288_v58 }
  0x43   : > { %1112 = vmatpush.bf16.msrb.mxu2 %v643_v32  ;;  %v313_v8 = vld [vmem:[%s2576_s0 + $0x238] sm:$0xff]  ;;  %v395_v10 = vld [vmem:[%s2577_s1 + $0x228] sm:$0xff]  ;;  %v538_v19 = vmax.f32 %v454_v6, 0.0  ;;  %v2168_v27 = vor.u32 %v1556_v60, %v1430_v59  ;;  %v1450_v33 = vld [vmem:[%s1827_s16 + $0x50] sm:$0xf] }
  0x44   : > { %869 = vmatmul.bf16.gmra.mxu0 %v2086_v28  ;;  %899 = vmatmul.bf16.gmra.mxu1 %v2088_v31  ;;  %v627_v62 = vpack.c.bf16 %v509_v50, %v507_v49  ;;  %v397_v11 = vld [vmem:[%s2577_s1 + $0x238] sm:$0xff]  ;;  %v537_v12 = vmax.f32 %v453_v63, 0.0  ;;  %v479_v13 = vadd.f32 %v395_v10, %v311_v3  ;;  %v251_v15 = vld [vmem:[%s2576_s0 + $0x48] sm:$0xff]  ;;  %v540_v20 = vmax.f32 %v456_v7, 0.0  ;;  %v1522_v38 = vld [vmem:[%s1827_s16 + $0xe0] sm:$0xf] }
  0x45   : > { %v481_v14 = vadd.f32 %v397_v11, %v313_v8  ;;  %v253_v16 = vld [vmem:[%s2576_s0 + $0x58] sm:$0xff]  ;;  %v335_v17 = vld [vmem:[%s2577_s1 + $0x48] sm:$0xff]  ;;  %v282_v43 = vld [vmem:[%s2576_s0 + $0x140] sm:$0xff] }
  0x46   : > { %1049 = vmatpush.bf16.msrb.mxu3 %v627_v62  ;;  %v1574_v18 = vld [vmem:[%s1827_s16 + $0xc8] sm:$0xf0]  ;;  %v337_v21 = vld [vmem:[%s2577_s1 + $0x58] sm:$0xff]  ;;  %v419_v22 = vadd.f32 %v335_v17, %v251_v15  ;;  %v641_v23 = vpack.c.bf16 %v537_v12, %v535_v5  ;;  %v563_v24 = vmax.f32 %v479_v13, 0.0  ;;  %v642_v29 = vpack.c.bf16 %v540_v20, %v538_v19  ;;  %v284_v44 = vld [vmem:[%s2576_s0 + $0x150] sm:$0xff] }
  0x47   : > { %v565_v25 = vmax.f32 %v481_v14, 0.0  ;;  %v421_v26 = vadd.f32 %v337_v21, %v253_v16  ;;  %v2170_v32 = vor.u32 %v1574_v18, %v1502_v4  ;;  %v1560_v37 = vld [vmem:[%s1827_s16 + $0x58] sm:$0xf0]  ;;  %v1578_v39 = vld [vmem:[%s1827_s16 + $0xe8] sm:$0xf0]  ;;  %v366_v46 = vld [vmem:[%s2577_s1 + $0x140] sm:$0xff] }
  0x48   : > { %v503_v30 = vmax.f32 %v419_v22, 0.0  ;;  %1113 = vmatpush.bf16.msrb.mxu2 %v641_v23  ;;  %923 = vmatpush.bf16.msrb.mxu1 %v642_v29  ;;  %v368_v47 = vld [vmem:[%s2577_s1 + $0x150] sm:$0xff]  ;;  %v450_v48 = vadd.f32 %v366_v46, %v282_v43  ;;  %v2190_v49 = vor.u32 %v1560_v37, %v1450_v33  ;;  %v279_v51 = vld [vmem:[%s2576_s0 + $0x128] sm:$0xff]  ;;  %v281_v52 = vld [vmem:[%s2576_s0 + $0x138] sm:$0xff]  ;;  %v2201_v54 = vor.u32 %v1578_v39, %v1522_v38 }
  0x49   : > { %v655_v34 = vpack.c.bf16 %v565_v25, %v563_v24  ;;  %v505_v35 = vmax.f32 %v421_v26, 0.0  ;;  %v452_v50 = vadd.f32 %v368_v47, %v284_v44  ;;  %v363_v53 = vld [vmem:[%s2577_s1 + $0x128] sm:$0xff]  ;;  %v365_v56 = vld [vmem:[%s2577_s1 + $0x138] sm:$0xff]  ;;  %v278_v62 = vld [vmem:[%s2576_s0 + $0x120] sm:$0xff] }
  0x4a   : > { %1526 = vmatmul.msk.bf16.gmra.mxu2 %vm822_vm0, %v2096_v41  ;;  %v534_v55 = vmax.f32 %v450_v48, 0.0  ;;  %v447_v58 = vadd.f32 %v363_v53, %v279_v51  ;;  %v449_v60 = vadd.f32 %v365_v56, %v281_v52  ;;  %v280_v63 = vld [vmem:[%s2576_s0 + $0x130] sm:$0xff]  ;;  %v362_v0 = vld [vmem:[%s2577_s1 + $0x120] sm:$0xff]  ;;  %v1442_v5 = vld [vmem:[%s1827_s16 + $0x48] sm:$0xf] }
  0x4b   : > { %1532 = vmatmul.msk.bf16.gmra.mxu3 %vm822_vm0, %v2107_v45  ;;  %1177 = vmatpush.bf16.msrb.mxu0 %v655_v34  ;;  %v625_v42 = vpack.c.bf16 %v505_v35, %v503_v30  ;;  %v536_v59 = vmax.f32 %v452_v50, 0.0  ;;  %v364_v3 = vld [vmem:[%s2577_s1 + $0x130] sm:$0xff]  ;;  %v446_v4 = vadd.f32 %v362_v0, %v278_v62  ;;  %v247_v10 = vld [vmem:[%s2576_s0 + $0x28] sm:$0xff]  ;;  %v249_v11 = vld [vmem:[%s2576_s0 + $0x38] sm:$0xff] }
  0x4c   : > { %v531_v2 = vmax.f32 %v447_v58, 0.0  ;;  %v1559_v6 = vld [vmem:[%s1827_s16 + $0x50] sm:$0xf0]  ;;  %v533_v8 = vmax.f32 %v449_v60, 0.0  ;;  %v331_v12 = vld [vmem:[%s2577_s1 + $0x28] sm:$0xff]  ;;  %v448_v13 = vadd.f32 %v364_v3, %v280_v63  ;;  %v333_v14 = vld [vmem:[%s2577_s1 + $0x38] sm:$0xff] }
  0x4d   : > { %1050 = vmatpush.bf16.msrb.mxu3 %v625_v42  ;;  %v640_v7 = vpack.c.bf16 %v536_v59, %v534_v55  ;;  %v415_v15 = vadd.f32 %v331_v12, %v247_v10  ;;  %v530_v16 = vmax.f32 %v446_v4, 0.0  ;;  %v274_v17 = vld [vmem:[%s2576_s0 + $0x100] sm:$0xff]  ;;  %v276_v18 = vld [vmem:[%s2576_s0 + $0x110] sm:$0xff]  ;;  %v417_v20 = vadd.f32 %v333_v14, %v249_v11  ;;  %v307_v24 = vld [vmem:[%s2576_s0 + $0x208] sm:$0xff] }
  0x4e   : > { %v639_v19 = vpack.c.bf16 %v533_v8, %v531_v2  ;;  %v532_v21 = vmax.f32 %v448_v13, 0.0  ;;  %v358_v22 = vld [vmem:[%s2577_s1 + $0x100] sm:$0xff]  ;;  %v360_v23 = vld [vmem:[%s2577_s1 + $0x110] sm:$0xff]  ;;  %v1514_v25 = vld [vmem:[%s1827_s16 + $0xd8] sm:$0xf]  ;;  %v2271_v48 = vor.u32 %v1559_v6, %v1442_v5 }
  0x4f   : > { %924 = vmatpush.bf16.msrb.mxu1 %v640_v7  ;;  %v1577_v26 = vld [vmem:[%s1827_s16 + $0xe0] sm:$0xf0]  ;;  %v499_v29 = vmax.f32 %v415_v15, 0.0  ;;  %v442_v30 = vadd.f32 %v358_v22, %v274_v17  ;;  %v444_v33 = vadd.f32 %v360_v23, %v276_v18  ;;  %v309_v34 = vld [vmem:[%s2576_s0 + $0x218] sm:$0xff]  ;;  %v391_v35 = vld [vmem:[%s2577_s1 + $0x208] sm:$0xff]  ;;  %v501_v38 = vmax.f32 %v417_v20, 0.0 }
  0x50   : > { %v393_v37 = vld [vmem:[%s2577_s1 + $0x218] sm:$0xff]  ;;  %1114 = vmatpush.bf16.msrb.mxu2 %v639_v19  ;;  %v638_v39 = vpack.c.bf16 %v532_v21, %v530_v16  ;;  %v475_v42 = vadd.f32 %v391_v35, %v307_v24  ;;  %v275_v44 = vld [vmem:[%s2576_s0 + $0x108] sm:$0xff]  ;;  %v2289_v7 = vor.u32 %v1577_v26, %v1514_v25  ;;  %v1563_v12 = vld [vmem:[%s1827_s16 + $0x70] sm:$0xf0] }
  0x51   : > { %v477_v43 = vadd.f32 %v393_v37, %v309_v34  ;;  %v277_v46 = vld [vmem:[%s2576_s0 + $0x118] sm:$0xff]  ;;  %v359_v47 = vld [vmem:[%s2577_s1 + $0x108] sm:$0xff]  ;;  %v526_v50 = vmax.f32 %v442_v30, 0.0  ;;  %v528_v51 = vmax.f32 %v444_v33, 0.0  ;;  %v623_v59 = vpack.c.bf16 %v501_v38, %v499_v29  ;;  %v2302_v20 = vld [vmem:[%s1827_s16 + $0xf0] sm:$0xff] }
  0x52   : > { %v361_v52 = vld [vmem:[%s2577_s1 + $0x118] sm:$0xff]  ;;  %v443_v53 = vadd.f32 %v359_v47, %v275_v44  ;;  %v243_v55 = vld [vmem:[%s2576_s0 + $0x8] sm:$0xff]  ;;  %v559_v60 = vmax.f32 %v475_v42, 0.0  ;;  %v1454_v21 = vld [vmem:[%s1827_s16 + $0x60] sm:$0xf]  ;;  %v764_v23 = vunpack.c.l.b16 %v2302_v20 }
  0x53   : > { %v245_v56 = vld [vmem:[%s2576_s0 + $0x18] sm:$0xff]  ;;  %925 = vmatpush.bf16.msrb.mxu1 %v638_v39  ;;  %v561_v62 = vmax.f32 %v477_v43, 0.0  ;;  %v445_v63 = vadd.f32 %v361_v52, %v277_v46  ;;  %v327_v0 = vld [vmem:[%s2577_s1 + $0x8] sm:$0xff]  ;;  %v636_v3 = vpack.c.bf16 %v528_v51, %v526_v50  ;;  %1051 = vmatpush.bf16.msrb.mxu3 %v623_v59  ;;  %v1474_v26 = vld [vmem:[%s1827_s16 + $0x80] sm:$0xf] }
  0x54   : > { %874 = vmatmul.bf16.gmra.mxu0 %v2168_v27  ;;  %904 = vmatmul.bf16.gmra.mxu1 %v2170_v32  ;;  %v619_v58 = vld [vmem:[%s1827_s16 + $0xf8] sm:$0xf]  ;;  %v527_v4 = vmax.f32 %v443_v53, 0.0  ;;  %v411_v5 = vadd.f32 %v327_v0, %v243_v55  ;;  %v1462_v11 = vld [vmem:[%s1827_s16 + $0x68] sm:$0xf]  ;;  %v2309_v25 = vpack.c.b16 %v764_v23, %v764_v23 }
  0x55   : > { %v329_v2 = vld [vmem:[%s2577_s1 + $0x18] sm:$0xff]  ;;  %v653_v8 = vpack.c.bf16 %v561_v62, %v559_v60  ;;  %v529_v10 = vmax.f32 %v445_v63, 0.0  ;;  %v766_v13 = vunpack.c.l.b16 %v619_v58  ;;  %v2295_v18 = vor.u32 %v1563_v12, %v1462_v11  ;;  %v1562_v22 = vld [vmem:[%s1827_s16 + $0x68] sm:$0xf0]  ;;  %v1565_v34 = vld [vmem:[%s1827_s16 + $0x80] sm:$0xf0] }
  0x56   : > { %v413_v6 = vadd.f32 %v329_v2, %v245_v56  ;;  %v495_v14 = vmax.f32 %v411_v5, 0.0  ;;  %v1455_v24 = vor.u32 %v1562_v22, %v1454_v21  ;;  %v1566_v29 = vld [vmem:[%s1827_s16 + $0x88] sm:$0xf0]  ;;  %v1466_v33 = vld [vmem:[%s1827_s16 + $0x78] sm:$0xf] }
  0x57   : > { %926 = vmatpush.bf16.msrb.mxu1 %v636_v3  ;;  %1178 = vmatpush.bf16.msrb.mxu0 %v653_v8  ;;  %v637_v16 = vpack.c.bf16 %v529_v10, %v527_v4  ;;  %v2297_v19 = vpack.c.b16 %v766_v13, %v766_v13  ;;  %v2314_v30 = vor.u32 %v1566_v29, %v1474_v26  ;;  %v1549_v35 = vld [vmem:[%s1827_s16 + $0x4] sm:$0xf]  ;;  %v1408_v37 = vld [vmem:[%s1827_s16 + $0xc] sm:$0xf0]  ;;  %v1552_v42 = vld [vmem:[%s1827_s16 + $0x1c] sm:$0xf] }
  0x58   : > { %v497_v15 = vmax.f32 %v413_v6, 0.0  ;;  %v1467_v38 = vor.u32 %v1565_v34, %v1466_v33  ;;  %v1411_v39 = vor.u32 %v1549_v35, %v1408_v37  ;;  %v1420_v43 = vld [vmem:[%s1827_s16 + $0x24] sm:$0xf0]  ;;  %v1432_v46 = vld [vmem:[%s1827_s16 + $0x3c] sm:$0xf0] }
  0x59   : > { %1115 = vmatpush.bf16.msrb.mxu2 %v637_v16  ;;  %v1423_v44 = vor.u32 %v1552_v42, %v1420_v43  ;;  %v1444_v51 = vld [vmem:[%s1827_s16 + $0x54] sm:$0xf0]  ;;  %v1561_v60 = vld [vmem:[%s1827_s16 + $0x64] sm:$0xf]  ;;  %v1456_v62 = vld [vmem:[%s1827_s16 + $0x6c] sm:$0xf0] }
  0x5a   : > { %1527 = vmatmul.msk.bf16.gmra.mxu2 %vm822_vm0, %v2190_v49  ;;  %v621_v17 = vpack.c.bf16 %v497_v15, %v495_v14  ;;  %v1564_v10 = vld [vmem:[%s1827_s16 + $0x7c] sm:$0xf]  ;;  %v1468_v11 = vld [vmem:[%s1827_s16 + $0x84] sm:$0xf0]  ;;  %v1567_v23 = vld [vmem:[%s1827_s16 + $0x94] sm:$0xf] }
  0x5b   : > { %1533 = vmatmul.msk.bf16.gmra.mxu3 %vm822_vm0, %v2201_v54  ;;  %v1492_v42 = vld [vmem:[%s1827_s16 + $0xb4] sm:$0xf0] }
  0x5c   : > { %1052 = vmatpush.bf16.msrb.mxu3 %v621_v17 }
  0x64   : > { %879 = vmatmul.bf16.gmra.mxu0 %v2271_v48  ;;  %909 = vmatmul.bf16.gmra.mxu1 %v2289_v7 }
  0x6a   : > { %1528 = vmatmul.msk.bf16.gmra.mxu2 %vm822_vm0, %v2295_v18 }
  0x6b   : > { %1534 = vmatmul.msk.bf16.gmra.mxu3 %vm822_vm0, %v2297_v19 }
  0x74   : > { %884 = vmatmul.bf16.gmra.mxu0 %v1455_v24  ;;  %914 = vmatmul.bf16.gmra.mxu1 %v2309_v25 }
  0x7a   : > { %1529 = vmatmul.msk.bf16.gmra.mxu2 %vm822_vm0, %v2314_v30 }
  0x7b   : > { %1053 = vmatmul.bf16.vlgmr.msrb.gmra.mxu3 %v1962_v57  ;;  %v1555_v57 = vld [vmem:[%s1827_s16 + $0x34] sm:$0xf] }
  0x7c   : > { %v1435_v47 = vor.u32 %v1555_v57, %v1432_v46 }
  0x84   : > { %889 = vmatmul.bf16.gmra.mxu0 %v1467_v38  ;;  %927 = vmatmul.bf16.vlgmr.msrb.gmra.mxu1 %v1411_v39 }
  0x8a   : > { %1116 = vmatmul.bf16.vlgmr.msrb.gmra.mxu2 %v1411_v39  ;;  %v1570_v39 = vld [vmem:[%s1827_s16 + $0xac] sm:$0xf] }
  0x8b   : > { %1058 = vmatmul.bf16.gmra.mxu3 %v2086_v28 }
  0x94   : > { %1535 = vmatmul.msk.bf16.vlgmr.msrb.gmra.mxu0 %vm822_vm0, %v1884_v61  ;;  %932 = vmatmul.bf16.gmra.mxu1 %v1423_v44  ;;  %v1558_v61 = vld [vmem:[%s1827_s16 + $0x4c] sm:$0xf] }
  0x9a   : > { %1121 = vmatmul.bf16.gmra.mxu2 %v1423_v44 }
  0x9b   : > { %1063 = vmatmul.bf16.gmra.mxu3 %v2168_v27  ;;  %v1447_v27 = vor.u32 %v1558_v61, %v1444_v51 }
  0xa4   : > { %1536 = vmatmul.msk.bf16.gmra.mxu0 %vm822_vm0, %v2014_v36  ;;  %937 = vmatmul.bf16.gmra.mxu1 %v1435_v47 }
  0xaa   : > { %1126 = vmatmul.bf16.gmra.mxu2 %v1435_v47 }
  0xab   : > { %1068 = vmatmul.bf16.gmra.mxu3 %v2271_v48 }
  0xad   : > { %v2334_v28 = vpop.f32.mrf.mxu2  ;;  %v2336_v50 = vpop.f32.mrf.mxu3 }
  0xb1   : > { %v2340_v52 = vpop.f32.mrf.mxu0  ;;  %v2342_v53 = vpop.f32.mrf.mxu1 }
  0xb4   : > { %1537 = vmatmul.msk.bf16.gmra.mxu0 %vm822_vm0, %v2096_v41  ;;  %942 = vmatmul.bf16.gmra.mxu1 %v1447_v27  ;;  %v1459_v41 = vor.u32 %v1561_v60, %v1456_v62  ;;  %v1504_v60 = vld [vmem:[%s1827_s16 + $0xcc] sm:$0xf0] }
  0xb5   : > { %v2344_v55 = vpop.f32.mrf.mxu2  ;;  %v2348_v36 = vpop.f32.mrf.mxu3 }
  0xb9   : > { %v2350_v48 = vpop.f32.mrf.mxu0  ;;  %v2352_v56 = vpop.f32.mrf.mxu1 }
  0xba   : > { %1131 = vmatmul.bf16.gmra.mxu2 %v1447_v27  ;;  %v1573_v27 = vld [vmem:[%s1827_s16 + $0xc4] sm:$0xf] }
  0xbb   : > { %1073 = vmatmul.bf16.gmra.mxu3 %v1455_v24  ;;  %v1480_v24 = vld [vmem:[%s1827_s16 + $0x9c] sm:$0xf0] }
  0xbd   : > { %v2354_v58 = vpop.f32.mrf.mxu2 }
  0xbe   : > { %v2356_v59 = vpop.f32.mrf.mxu3 }
  0xc1   : > { %v2360_v63 = vpop.f32.mrf.mxu0  ;;  %v2362_v0 = vpop.f32.mrf.mxu1 }
  0xc4   : > { %1538 = vmatmul.msk.bf16.gmra.mxu0 %vm822_vm0, %v2190_v49  ;;  %947 = vmatmul.bf16.gmra.mxu1 %v1459_v41  ;;  %v1471_v49 = vor.u32 %v1564_v10, %v1468_v11 }
  0xc5   : > { %v2364_v2 = vpop.f32.mrf.mxu2 }
  0xc6   : > { %v2368_v3 = vpop.f32.mrf.mxu3 }
  0xc9   : > { %v2370_v4 = vpop.f32.mrf.mxu0  ;;  %v2372_v5 = vpop.f32.mrf.mxu1 }
  0xca   : > { %1136 = vmatmul.bf16.gmra.mxu2 %v1459_v41  ;;  %v1507_v41 = vor.u32 %v1573_v27, %v1504_v60 }
  0xcb   : > { %1078 = vmatmul.bf16.gmra.mxu3 %v1467_v38 }
  0xcd   : > { %v2374_v6 = vpop.f32.mrf.mxu2 }
  0xce   : > { %v2376_v8 = vpop.f32.mrf.mxu3 }
  0xd1   : > { %v2380_v12 = vpop.f32.mrf.mxu0  ;;  %v2382_v13 = vpop.f32.mrf.mxu1 }
  0xd4   : > { %1539 = vmatmul.msk.bf16.gmra.mxu0 %vm822_vm0, %v2295_v18  ;;  %952 = vmatmul.bf16.gmra.mxu1 %v1471_v49  ;;  %v1483_v18 = vor.u32 %v1567_v23, %v1480_v24 }
  0xd5   : > { %v2384_v14 = vpop.f32.mrf.mxu2 }
  0xd6   : > { %v2388_v15 = vpop.f32.mrf.mxu3 }
  0xd9   : > { %v2390_v16 = vpop.f32.mrf.mxu0  ;;  %v2392_v17 = vpop.f32.mrf.mxu1 }
  0xda   : > { %1141 = vmatmul.bf16.gmra.mxu2 %v1471_v49 }
  0xdb   : > { %1083 = vmatmul.bf16.gmra.mxu3 %v1973_v1 }
  0xdd   : > { %v2395_v21 = vpop.f32.mrf.mxu2 }
  0xde   : > { %v2397_v22 = vpop.f32.mrf.mxu3 }
  0xe1   : > { %v2401_v26 = vpop.f32.mrf.mxu0  ;;  %v2403_v29 = vpop.f32.mrf.mxu1 }
  0xe4   : > { %1540 = vmatmul.msk.bf16.gmra.mxu0 %vm822_vm0, %v2314_v30  ;;  %957 = vmatmul.bf16.gmra.mxu1 %v1483_v18  ;;  %v1495_v30 = vor.u32 %v1570_v39, %v1492_v42 }
  0xe5   : > { %v2405_v33 = vpop.f32.mrf.mxu2 }
  0xe6   : > { %v2409_v1 = vpop.f32.mrf.mxu3 }
  0xe9   : > { %v2411_v34 = vpop.f32.mrf.mxu0  ;;  %v2413_v35 = vpop.f32.mrf.mxu1 }
  0xea   : > { %1146 = vmatmul.bf16.gmra.mxu2 %v1483_v18 }
  0xeb   : > { %1088 = vmatmul.bf16.gmra.mxu3 %v2088_v31 }
  0xed   : > { %v2416_v37 = vpop.f32.mrf.mxu2 }
  0xee   : > { %v2418_v38 = vpop.f32.mrf.mxu3 }
  0xf1   : > { %v2422_v43 = vpop.f32.mrf.mxu0  ;;  %v2424_v44 = vpop.f32.mrf.mxu1 }
  0xf4   : > { %1541 = vmatmul.msk.bf16.gmra.mxu0 %vm822_vm0, %v1898_v9  ;;  %962 = vmatmul.bf16.gmra.mxu1 %v1495_v30 }
  0xf5   : > { %v2426_v57 = vpop.f32.mrf.mxu2 }
  0xf6   : > { %v1043_v31 = vpop.f32.mrf.mxu3 }
  0xf9   : > { %v2430_v46 = vpop.f32.mrf.mxu0  ;;  %v917_v47 = vpop.f32.mrf.mxu1 }
  0xfa   : > { %1151 = vmatmul.bf16.gmra.mxu2 %v1495_v30  ;;  %v1576_v30 = vld [vmem:[%s1827_s16 + $0xdc] sm:$0xf] }
  0xfb   : > { %1093 = vmatmul.bf16.gmra.mxu3 %v2170_v32 }
  0xfd   : > { %v2433_v61 = vpop.f32.mrf.mxu2 }
  0xfe   : > { %v1054_v51 = vpop.f32.mrf.mxu3 }
 0x101   : > { %v2437_v62 = vpop.f32.mrf.mxu0  ;;  %v928_v10 = vpop.f32.mrf.mxu1 }
 0x102   : > { %v929_v9 = vadd.f32 %v928_v10, %v2340_v52 }
 0x104   : > { %1542 = vmatmul.msk.bf16.gmra.mxu0 %vm822_vm0, %v2019_v40  ;;  %v992_v11 = vadd.f32 %v2334_v28, %v929_v9  ;;  %967 = vmatmul.bf16.gmra.mxu1 %v1507_v41  ;;  %v1516_v28 = vld [vmem:[%s1827_s16 + $0xe4] sm:$0xf0] }
 0x105   : > { %v2446_v32 = vpop.f32.mrf.mxu2  ;;  %v1519_v47 = vor.u32 %v1576_v30, %v1516_v28 }
 0x106   : > { %v1056_v49 = vpop.f32.mrf.mxu3  ;;  %1234 = vst [vmem:[%s2444_s18] sm:$0xff] %v992_v11 }
 0x109   : > { %v2452_v52 = vpop.f32.mrf.mxu0  ;;  %v930_v23 = vpop.f32.mrf.mxu1 }
 0x10a   : > { %1156 = vmatmul.bf16.gmra.mxu2 %v1507_v41  ;;  %v931_v24 = vadd.f32 %v930_v23, %v2350_v48 }
 0x10b   : > { %1098 = vmatmul.bf16.gmra.mxu3 %v2289_v7 }
 0x10c   : > { %v994_v39 = vadd.f32 %v2344_v55, %v931_v24 }
 0x10d   : > { %v1117_v18 = vpop.f32.mrf.mxu2 }
 0x10e   : > { %v1059_v42 = vpop.f32.mrf.mxu3  ;;  %v1118_v40 = vadd.f32 %v1117_v18, %v1054_v51  ;;  %1237 = vst [vmem:[%s2444_s18 + $0x10] sm:$0xff] %v994_v39 }
 0x111   : > { %v1180_v31 = vpop.f32.mrf.mxu0  ;;  %v933_v27 = vpop.f32.mrf.mxu1 }
 0x112   : > { %v1181_v60 = vadd.f32 %v1180_v31, %v1118_v40  ;;  %v934_v41 = vadd.f32 %v933_v27, %v2360_v63 }
 0x114   : > { %1236 = vst.msk [vmem:[%s2444_s18 + $0x8] sm:$0xff] %vm1235_vm1, %v1181_v60  ;;  %1543 = vmatmul.msk.bf16.gmra.mxu0 %vm822_vm0, %v2107_v45  ;;  %v997_v55 = vadd.f32 %v2354_v58, %v934_v41  ;;  %972 = vmatmul.bf16.gmra.mxu1 %v1519_v47  ;;  %v765_v45 = vunpack.c.h.b16 %v2302_v20 }
 0x115   : > { %v1119_v7 = vpop.f32.mrf.mxu2 }
 0x116   : > { %v1061_v48 = vpop.f32.mrf.mxu3  ;;  %1239 = vst [vmem:[%s2444_s18 + $0x20] sm:$0xff] %v997_v55  ;;  %v1120_v51 = vadd.f32 %v1119_v7, %v1056_v49  ;;  %v798_v39 = vpack.c.b16 %v765_v45, %v765_v45 }
 0x119   : > { %v1182_v10 = vpop.f32.mrf.mxu0  ;;  %v935_v9 = vpop.f32.mrf.mxu1 }
 0x11a   : > { %1161 = vmatmul.bf16.gmra.mxu2 %v1519_v47  ;;  %v1183_v11 = vadd.f32 %v1182_v10, %v1120_v51  ;;  %v936_v63 = vadd.f32 %v935_v9, %v2370_v4 }
 0x11b   : > { %1103 = vmatmul.bf16.gmra.mxu3 %v2309_v25 }
 0x11c   : > { %1238 = vst.msk [vmem:[%s2444_s18 + $0x18] sm:$0xff] %vm1235_vm1, %v1183_v11  ;;  %v999_v58 = vadd.f32 %v2364_v2, %v936_v63 }
 0x11d   : > { %v1122_v23 = vpop.f32.mrf.mxu2 }
 0x11e   : > { %v1064_v24 = vpop.f32.mrf.mxu3  ;;  %v1123_v18 = vadd.f32 %v1122_v23, %v1059_v42  ;;  %1241 = vst [vmem:[%s2444_s18 + $0x30] sm:$0xff] %v999_v58 }
 0x121   : > { %v1185_v49 = vpop.f32.mrf.mxu0  ;;  %v938_v40 = vpop.f32.mrf.mxu1 }
 0x122   : > { %v1186_v30 = vadd.f32 %v1185_v49, %v1123_v18  ;;  %v939_v25 = vadd.f32 %v938_v40, %v2380_v12 }
 0x124   : > { %1240 = vst.msk [vmem:[%s2444_s18 + $0x28] sm:$0xff] %vm1235_vm1, %v1186_v30  ;;  %1544 = vmatmul.msk.bf16.gmra.mxu0 %vm822_vm0, %v2201_v54  ;;  %v1002_v20 = vadd.f32 %v2374_v6, %v939_v25  ;;  %977 = vmatmul.bf16.gmra.mxu1 %v798_v39 }
 0x125   : > { %v1124_v4 = vpop.f32.mrf.mxu2 }
 0x126   : > { %v1066_v2 = vpop.f32.mrf.mxu3  ;;  %1243 = vst [vmem:[%s2444_s18 + $0x40] sm:$0xff] %v1002_v20  ;;  %v1125_v42 = vadd.f32 %v1124_v4, %v1061_v48 }
 0x129   : > { %v1187_v28 = vpop.f32.mrf.mxu0  ;;  %v940_v31 = vpop.f32.mrf.mxu1 }
 0x12a   : > { %1166 = vmatmul.bf16.gmra.mxu2 %v798_v39  ;;  %v1188_v47 = vadd.f32 %v1187_v28, %v1125_v42  ;;  %v941_v12 = vadd.f32 %v940_v31, %v2390_v16 }
 0x12c   : > { %1242 = vst.msk [vmem:[%s2444_s18 + $0x38] sm:$0xff] %vm1235_vm1, %v1188_v47  ;;  %v1004_v54 = vadd.f32 %v2384_v14, %v941_v12 }
 0x12d   : > { %v1127_v27 = vpop.f32.mrf.mxu2 }
 0x12e   : > { %v1069_v60 = vpop.f32.mrf.mxu3  ;;  %v1128_v41 = vadd.f32 %v1127_v27, %v1064_v24  ;;  %1245 = vst [vmem:[%s2444_s18 + $0x50] sm:$0xff] %v1004_v54 }
 0x131   : > { %v1190_v6 = vpop.f32.mrf.mxu0  ;;  %v943_v7 = vpop.f32.mrf.mxu1 }
 0x132   : > { %v1191_v55 = vadd.f32 %v1190_v6, %v1128_v41  ;;  %v944_v48 = vadd.f32 %v943_v7, %v2401_v26 }
 0x134   : > { %1244 = vst.msk [vmem:[%s2444_s18 + $0x48] sm:$0xff] %vm1235_vm1, %v1191_v55  ;;  %1545 = vmatmul.msk.bf16.gmra.mxu0 %vm822_vm0, %v2297_v19  ;;  %v1007_v16 = vadd.f32 %v2395_v21, %v944_v48 }
 0x135   : > { %v1129_v51 = vpop.f32.mrf.mxu2 }
 0x136   : > { %v1071_v10 = vpop.f32.mrf.mxu3  ;;  %1247 = vst [vmem:[%s2444_s18 + $0x60] sm:$0xff] %v1007_v16  ;;  %v1130_v14 = vadd.f32 %v1129_v51, %v1066_v2 }
 0x139   : > { %v1192_v9 = vpop.f32.mrf.mxu0  ;;  %v945_v11 = vpop.f32.mrf.mxu1 }
 0x13a   : > { %v1193_v63 = vadd.f32 %v1192_v9, %v1130_v14  ;;  %v946_v23 = vadd.f32 %v945_v11, %v2411_v34 }
 0x13c   : > { %1246 = vst.msk [vmem:[%s2444_s18 + $0x58] sm:$0xff] %vm1235_vm1, %v1193_v63  ;;  %v1009_v45 = vadd.f32 %v2405_v33, %v946_v23 }
 0x13d   : > { %v1132_v26 = vpop.f32.mrf.mxu2 }
 0x13e   : > { %v1074_v58 = vpop.f32.mrf.mxu3  ;;  %v1133_v24 = vadd.f32 %v1132_v26, %v1069_v60  ;;  %1249 = vst [vmem:[%s2444_s18 + $0x70] sm:$0xff] %v1009_v45 }
 0x141   : > { %v1195_v19 = vpop.f32.mrf.mxu0  ;;  %v948_v21 = vpop.f32.mrf.mxu1 }
 0x142   : > { %v1196_v18 = vadd.f32 %v1195_v19, %v1133_v24  ;;  %v949_v49 = vadd.f32 %v948_v21, %v2422_v43 }
 0x144   : > { %1248 = vst.msk [vmem:[%s2444_s18 + $0x68] sm:$0xff] %vm1235_vm1, %v1196_v18  ;;  %v1012_v34 = vadd.f32 %v2416_v37, %v949_v49 }
 0x145   : > { %v1134_v39 = vpop.f32.mrf.mxu2 }
 0x146   : > { %v1076_v40 = vpop.f32.mrf.mxu3  ;;  %1251 = vst [vmem:[%s2444_s18 + $0x80] sm:$0xff] %v1012_v34  ;;  %v1135_v30 = vadd.f32 %v1134_v39, %v1071_v10 }
 0x149   : > { %v1197_v33 = vpop.f32.mrf.mxu0  ;;  %v950_v25 = vpop.f32.mrf.mxu1 }
 0x14a   : > { %v1198_v4 = vadd.f32 %v1197_v33, %v1135_v30  ;;  %v951_v20 = vadd.f32 %v950_v25, %v2430_v46 }
 0x14c   : > { %1250 = vst.msk [vmem:[%s2444_s18 + $0x78] sm:$0xff] %vm1235_vm1, %v1198_v4  ;;  %v1014_v43 = vadd.f32 %v2426_v57, %v951_v20 }
 0x14d   : > { %v1137_v2 = vpop.f32.mrf.mxu2 }
 0x14e   : > { %v1079_v42 = vpop.f32.mrf.mxu3  ;;  %v1138_v28 = vadd.f32 %v1137_v2, %v1074_v58  ;;  %1253 = vst [vmem:[%s2444_s18 + $0x90] sm:$0xff] %v1014_v43 }
 0x151   : > { %v1200_v37 = vpop.f32.mrf.mxu0  ;;  %v953_v31 = vpop.f32.mrf.mxu1 }
 0x152   : > { %v1201_v47 = vadd.f32 %v1200_v37, %v1138_v28  ;;  %v954_v12 = vadd.f32 %v953_v31, %v2437_v62 }
 0x154   : > { %1252 = vst.msk [vmem:[%s2444_s18 + $0x88] sm:$0xff] %vm1235_vm1, %v1201_v47  ;;  %v1017_v46 = vadd.f32 %v2433_v61, %v954_v12 }
 0x155   : > { %v1139_v27 = vpop.f32.mrf.mxu2 }
 0x156   : > { %v1081_v54 = vpop.f32.mrf.mxu3  ;;  %1255 = vst [vmem:[%s2444_s18 + $0xa0] sm:$0xff] %v1017_v46  ;;  %v1140_v60 = vadd.f32 %v1139_v27, %v1076_v40 }
 0x159   : > { %v1202_v57 = vpop.f32.mrf.mxu0  ;;  %v955_v41 = vpop.f32.mrf.mxu1 }
 0x15a   : > { %v1203_v6 = vadd.f32 %v1202_v57, %v1140_v60  ;;  %v956_v7 = vadd.f32 %v955_v41, %v2452_v52 }
 0x15c   : > { %1254 = vst.msk [vmem:[%s2444_s18 + $0x98] sm:$0xff] %vm1235_vm1, %v1203_v6  ;;  %v1019_v62 = vadd.f32 %v2446_v32, %v956_v7 }
 0x15d   : > { %v1142_v55 = vpop.f32.mrf.mxu2 }
 0x15e   : > { %v1084_v48 = vpop.f32.mrf.mxu3  ;;  %v1143_v51 = vadd.f32 %v1142_v55, %v1079_v42  ;;  %1257 = vst [vmem:[%s2444_s18 + $0xb0] sm:$0xff] %v1019_v62 }
 0x161   : > { %v1205_v61 = vpop.f32.mrf.mxu0  ;;  %v958_v16 = vpop.f32.mrf.mxu1 }
 0x162   : > { %v1206_v10 = vadd.f32 %v1205_v61, %v1143_v51  ;;  %v959_v14 = vadd.f32 %v958_v16, %v2342_v53 }
 0x164   : > { %1256 = vst.msk [vmem:[%s2444_s18 + $0xa8] sm:$0xff] %vm1235_vm1, %v1206_v10  ;;  %v1022_v52 = vadd.f32 %v2336_v50, %v959_v14 }
 0x165   : > { %v1144_v9 = vpop.f32.mrf.mxu2 }
 0x166   : > { %v1086_v11 = vpop.f32.mrf.mxu3  ;;  %1259 = vst [vmem:[%s2444_s18 + $0xc0] sm:$0xff] %v1022_v52  ;;  %v1145_v63 = vadd.f32 %v1144_v9, %v1081_v54 }
 0x169   : > { %v1207_v32 = vpop.f32.mrf.mxu0  ;;  %v960_v23 = vpop.f32.mrf.mxu1 }
 0x16a   : > { %v1208_v26 = vadd.f32 %v1207_v32, %v1145_v63  ;;  %v961_v45 = vadd.f32 %v960_v23, %v2352_v56 }
 0x16c   : > { %1258 = vst.msk [vmem:[%s2444_s18 + $0xb8] sm:$0xff] %vm1235_vm1, %v1208_v26  ;;  %v1024_v53 = vadd.f32 %v2348_v36, %v961_v45 }
 0x16d   : > { %v1147_v58 = vpop.f32.mrf.mxu2 }
 0x16e   : > { %v1089_v24 = vpop.f32.mrf.mxu3  ;;  %v1148_v19 = vadd.f32 %v1147_v58, %v1084_v48  ;;  %1261 = vst [vmem:[%s2444_s18 + $0xd0] sm:$0xff] %v1024_v53 }
 0x171   : > { %v1210_v50 = vpop.f32.mrf.mxu0  ;;  %v963_v21 = vpop.f32.mrf.mxu1 }
 0x172   : > { %v1211_v18 = vadd.f32 %v1210_v50, %v1148_v19  ;;  %v964_v49 = vadd.f32 %v963_v21, %v2362_v0 }
 0x174   : > { %1260 = vst.msk [vmem:[%s2444_s18 + $0xc8] sm:$0xff] %vm1235_vm1, %v1211_v18  ;;  %v1027_v56 = vadd.f32 %v2356_v59, %v964_v49 }
 0x175   : > { %v1149_v39 = vpop.f32.mrf.mxu2 }
 0x176   : > { %v1091_v34 = vpop.f32.mrf.mxu3  ;;  %1263 = vst [vmem:[%s2444_s18 + $0xe0] sm:$0xff] %v1027_v56  ;;  %v1150_v40 = vadd.f32 %v1149_v39, %v1086_v11 }
 0x179   : > { %v1212_v36 = vpop.f32.mrf.mxu0  ;;  %v965_v30 = vpop.f32.mrf.mxu1 }
 0x17a   : > { %v1213_v33 = vadd.f32 %v1212_v36, %v1150_v40  ;;  %v966_v25 = vadd.f32 %v965_v30, %v2372_v5 }
 0x17c   : > { %1262 = vst.msk [vmem:[%s2444_s18 + $0xd8] sm:$0xff] %vm1235_vm1, %v1213_v33  ;;  %v1029_v0 = vadd.f32 %v2368_v3, %v966_v25 }
 0x17d   : > { %v1152_v4 = vpop.f32.mrf.mxu2 }
 0x17e   : > { %v1094_v20 = vpop.f32.mrf.mxu3  ;;  %v1153_v2 = vadd.f32 %v1152_v4, %v1089_v24  ;;  %1265 = vst [vmem:[%s2444_s18 + $0xf0] sm:$0xff] %v1029_v0 }
 0x181   : > { %v1215_v59 = vpop.f32.mrf.mxu0  ;;  %v968_v43 = vpop.f32.mrf.mxu1 }
 0x182   : > { %v1216_v42 = vadd.f32 %v1215_v59, %v1153_v2  ;;  %v969_v28 = vadd.f32 %v968_v43, %v2382_v13 }
 0x184   : > { %1264 = vst.msk [vmem:[%s2444_s18 + $0xe8] sm:$0xff] %vm1235_vm1, %v1216_v42  ;;  %v1032_v5 = vadd.f32 %v2376_v8, %v969_v28 }
 0x185   : > { %v1154_v37 = vpop.f32.mrf.mxu2 }
 0x186   : > { %v1096_v31 = vpop.f32.mrf.mxu3  ;;  %1267 = vst [vmem:[%s2444_s18 + $0x100] sm:$0xff] %v1032_v5  ;;  %v1155_v47 = vadd.f32 %v1154_v37, %v1091_v34 }
 0x189   : > { %v1217_v3 = vpop.f32.mrf.mxu0  ;;  %v970_v12 = vpop.f32.mrf.mxu1 }
 0x18a   : > { %v1218_v27 = vadd.f32 %v1217_v3, %v1155_v47  ;;  %v971_v46 = vadd.f32 %v970_v12, %v2392_v17 }
 0x18c   : > { %1266 = vst.msk [vmem:[%s2444_s18 + $0xf8] sm:$0xff] %vm1235_vm1, %v1218_v27  ;;  %v1034_v13 = vadd.f32 %v2388_v15, %v971_v46 }
 0x18d   : > { %v1157_v54 = vpop.f32.mrf.mxu2 }
 0x18e   : > { %v1099_v60 = vpop.f32.mrf.mxu3  ;;  %v1158_v57 = vadd.f32 %v1157_v54, %v1094_v20  ;;  %1269 = vst [vmem:[%s2444_s18 + $0x110] sm:$0xff] %v1034_v13 }
 0x191   : > { %v1220_v8 = vpop.f32.mrf.mxu0  ;;  %v973_v41 = vpop.f32.mrf.mxu1 }
 0x192   : > { %v1221_v6 = vadd.f32 %v1220_v8, %v1158_v57  ;;  %v974_v7 = vadd.f32 %v973_v41, %v2403_v29 }
 0x194   : > { %1268 = vst.msk [vmem:[%s2444_s18 + $0x108] sm:$0xff] %vm1235_vm1, %v1221_v6  ;;  %v1037_v17 = vadd.f32 %v2397_v22, %v974_v7 }
 0x195   : > { %v1159_v55 = vpop.f32.mrf.mxu2 }
 0x196   : > { %v1101_v62 = vpop.f32.mrf.mxu3  ;;  %1271 = vst [vmem:[%s2444_s18 + $0x120] sm:$0xff] %v1037_v17  ;;  %v1160_v48 = vadd.f32 %v1159_v55, %v1096_v31 }
 0x199   : > { %v1222_v15 = vpop.f32.mrf.mxu0  ;;  %v975_v51 = vpop.f32.mrf.mxu1 }
 0x19a   : > { %v1223_v61 = vadd.f32 %v1222_v15, %v1160_v48  ;;  %v976_v16 = vadd.f32 %v975_v51, %v2413_v35 }
 0x19c   : > { %1270 = vst.msk [vmem:[%s2444_s18 + $0x118] sm:$0xff] %vm1235_vm1, %v1223_v61  ;;  %v1039_v29 = vadd.f32 %v2409_v1, %v976_v16 }
 0x19d   : > { %v1162_v10 = vpop.f32.mrf.mxu2 }
 0x19e   : > { %v1104_v14 = vpop.f32.mrf.mxu3  ;;  %v1163_v9 = vadd.f32 %v1162_v10, %v1099_v60  ;;  %1273 = vst [vmem:[%s2444_s18 + $0x130] sm:$0xff] %v1039_v29 }
 0x1a1   : > { %v1225_v22 = vpop.f32.mrf.mxu0  ;;  %v978_v52 = vpop.f32.mrf.mxu1 }
 0x1a2   : > { %v1226_v11 = vadd.f32 %v1225_v22, %v1163_v9  ;;  %v979_v63 = vadd.f32 %v978_v52, %v2424_v44 }
 0x1a4   : > { %1272 = vst.msk [vmem:[%s2444_s18 + $0x128] sm:$0xff] %vm1235_vm1, %v1226_v11  ;;  %v1042_v35 = vadd.f32 %v2418_v38, %v979_v63 }
 0x1a5   : > { %v1164_v32 = vpop.f32.mrf.mxu2 }
 0x1a6   : > { %v1106_v23 = vpop.f32.mrf.mxu3  ;;  %1275 = vst [vmem:[%s2444_s18 + $0x140] sm:$0xff] %v1042_v35  ;;  %v1165_v26 = vadd.f32 %v1164_v32, %v1101_v62 }
 0x1a9   : > { %v1227_v45 = vpop.f32.mrf.mxu0  ;;  %v980_v58 = vpop.f32.mrf.mxu1 }
 0x1aa   : > { %v1228_v1 = vadd.f32 %v1227_v45, %v1165_v26 }
 0x1ac   : > { %1274 = vst.msk [vmem:[%s2444_s18 + $0x138] sm:$0xff] %vm1235_vm1, %v1228_v1 }
 0x1ad   : > { %v1167_v53 = vpop.f32.mrf.mxu2 }
 0x1ae   : > { %v1168_v24 = vadd.f32 %v1167_v53, %v1104_v14 }
 0x1b1   : > { %v1230_v19 = vpop.f32.mrf.mxu0 }
 0x1b2   : > { %v1231_v50 = vadd.f32 %v1230_v19, %v1168_v24 }
 0x1b4   : > { %1276 = vst.msk [vmem:[%s2444_s18 + $0x148] sm:$0xff] %vm1235_vm1, %v1231_v50 }
 0x1b5   : > { %v1169_v44 = vpop.f32.mrf.mxu2 }
 0x1b9   : > { %v1232_v21 = vpop.f32.mrf.mxu0 }
 0x1ba PF: > { %s13_s14 = sadd.s32 1, %s1639_s14   ;;  %s2581_s12 = smov %s1635_s13 }
 0x1bb   : > { %p10_p5 = scmp.ge.s32.totalorder %s13_s14, 4   ;;  %s2582_s13 = smov %s2584_s15 }
 0x1bd   :  { %12 = sbr.rel (!%p10_p5) target bundleno = 2 (0x2), region = 68 }

</bundles_post_ra>
